<compile_context>
chip_gen: v7x
topology: tpu7x:2x2x1
jax: 0.10.0
libtpu: 0.0.40
codegen_flags: <defaults>
</compile_context>

<pallas_src>
import functools

import numpy as np
import jax
import jax.numpy as jnp
from jax.experimental import pallas as pl
from jax.experimental.pallas import tpu as pltpu

# ---------------- static config (mirrors cfg.n_inputs / cfg.cnn of CNN_11) ----
#   K[0]        = (win, f0)        -> first conv maps c -> f0 channels
#   K[1..j]     = [kernel, stride] -> conv layers; out-channels double each layer
#   K[j+1 ...]  = ints             -> per-branch linear layer widths
N_INPUTS = 4                      # raw channels; each branch gets c = N_INPUTS // 2
SEQ_LEN = 16
K_CFG = [(SEQ_LEN, 8), [4, 4], [4, 1], 32, 16]


def _model_dims():
    """Re-derive the layer shapes exactly the way CNN_11.__init__ does."""
    c = N_INPUTS // 2
    convs = []                      # (cin, cout, kernel, stride, l_in, l_out)
    fin, fout = c, K_CFG[0][1]
    length = SEQ_LEN
    i = 1
    while isinstance(K_CFG[i], (list, tuple)):
        k, s = K_CFG[i]
        l_out = (length - k) // s + 1
        convs.append((fin, fout, k, s, length, l_out))
        fin, fout = fout, fout * 2
        length = l_out
        i += 1
    f = fin                         # feature size used by x.view(-1, f)
    lins, n1 = [], f
    while i < len(K_CFG):
        lins.append((n1, K_CFG[i]))
        n1 = K_CFG[i]
        i += 1
    return c, tuple(convs), f, length, tuple(lins), n1


def _round8(n):
    return (n + 7) // 8 * 8


def _layer_plan():
    """Static fused-layer plan.

    Every network layer (both branches at once) becomes a single matmul
    h @ W + b.  Returns, per fused layer, (w_row_off, nin, nout, b_row_off, relu)
    -- where the (nin, nout) weight block and the (1, nout) bias row live inside
    the packed parameter slab -- plus the slab shape (rows, width).
    All row offsets are multiples of 8 (sublane-aligned static ref views).
    """
    c, convs, f, l_final, lins, n_last = _model_dims()
    fused = []
    # conv layer 0: consumes the host-side, branch-fused im2col (B, l_out*2*k*c)
    cin, cout, k, s, l_in, l_out = convs[0]
    fused.append((l_out * 2 * k * cin, l_out * 2 * cout, True))
    # deeper conv layers: consume the previous conv activation (B, l_in*2*cin)
    for (cin, cout, k, s, l_in, l_out) in convs[1:]:
        fused.append((l_in * 2 * cin, l_out * 2 * cout, True))
    # linear layers: block-diagonal over the two branches
    for (nin, nout) in lins:
        fused.append((2 * nin, 2 * nout, True))
    # final layer: fused activation layout already equals torch.cat((x1, x2), 1)
    fused.append((2 * n_last, 1, False))

    plan, row = [], 0
    for (nin, nout, relu) in fused:
        w_off = row
        row += _round8(nin)
        b_off = row
        row += 8
        plan.append((w_off, nin, nout, b_off, relu))
    width = max(nout for (_, nout, _) in fused)
    return tuple(plan), row, width


# ------------------------------- fused kernel ---------------------------------
def _cnn11_kernel(x_ref, slab_ref, out_ref, *, plan):
    """Whole CNN_11 forward as len(plan) back-to-back single-tile f32 matmuls.

    Activations never leave vregs; weights and biases are static views into a
    single VMEM-resident parameter slab (so there are only 2 input DMAs).
    """
    h = x_ref[...]                                   # (B, nin_0) f32
    for (w_off, nin, nout, b_off, relu) in plan:
        w = slab_ref[w_off:w_off + nin, 0:nout]      # static, sublane-aligned view
        b = slab_ref[b_off:b_off + 1, 0:nout]
        h = jnp.dot(h, w, preferred_element_type=jnp.float32) + b
        if relu:
            h = jnp.maximum(h, 0.0)
    out_ref[...] = h                                 # (B, 1)


# ------------------------------- host wrapper ----------------------------------
def _pack_input(x):
    """Single host-side layout op: branch-fused im2col for the first conv.

    (B, 2c, T) -> (B, l_out1 * 2 * k1 * c) with
        column = t_out*(2*k*c) + branch*(k*c) + tap*c + ci
    When kernel == stride (the K_CFG default) this is a pure reshape/transpose.
    """
    c, convs, *_ = _model_dims()
    cin, cout, k, s, l_in, l_out = convs[0]
    b = x.shape[0]
    if k == s and l_in == l_out * k:
        xg = x.reshape(b, 2 * c, l_out, k)           # time -> (t_out, tap)
    else:
        idx = np.arange(l_out)[:, None] * s + np.arange(k)[None, :]
        xg = x[:, :, idx]                            # (B, 2c, l_out, k) gather
    xg = xg.reshape(b, 2, c, l_out, k)               # channel -> (branch, ci)
    xg = jnp.transpose(xg, (0, 3, 1, 4, 2))          # (B, t_out, branch, tap, ci)
    return xg.reshape(b, l_out * 2 * k * c)


def cnn11_forward(x, slab):
    c, convs, f, l_final, lins, n_last = _model_dims()
    # TODO(synk): replicate torch's batch/time-mixing x.view(-1, f) when l_final > 1.
    assert l_final == 1, "conv stack must reduce length to 1 to match x.view(-1, f)"
    batch = x.shape[0]
    plan, n_rows, width = _layer_plan()
    assert slab.shape == (n_rows, width)

    x_packed = _pack_input(x)
    kernel = functools.partial(_cnn11_kernel, plan=plan)
    # Single-shot launch (no grid): at batch=2 per-grid-step overhead (~0.35us)
    # exceeds the compute.
    # TODO(synk): for large batches add a leading "parallel" batch grid axis
    # (uses both TensorCores on v7x) with row blocks in multiples of 8.
    return pl.pallas_call(
        kernel,
        out_shape=jax.ShapeDtypeStruct((batch, 1), jnp.float32),
        in_specs=[pl.BlockSpec(memory_space=pltpu.MemorySpace.VMEM),
                  pl.BlockSpec(memory_space=pltpu.MemorySpace.VMEM)],
        out_specs=pl.BlockSpec(memory_space=pltpu.MemorySpace.VMEM),
    )(x_packed, slab)


# --------------------------------- init ----------------------------------------
def init_params(key):
    """PyTorch-default init (U(+-1/sqrt(fan_in))) for every per-branch layer,
    packed ONCE into a single contiguous f32 slab (weights as branch-fused /
    block-diagonal matrices, biases as single rows).  Also returns the raw
    torch-layout params for the numpy reference check."""
    c, convs, f, l_final, lins, n_last = _model_dims()
    plan, n_rows, width = _layer_plan()

    def uni(rng, shape, fan_in):
        bound = 1.0 / float(fan_in) ** 0.5
        return np.asarray(jax.random.uniform(rng, shape, jnp.float32, -bound, bound))

    n_keys = 2 * (2 * len(convs) + 2 * len(lins)) + 2
    keys = iter(jax.random.split(key, n_keys))

    conv_p = [[], []]
    for br in range(2):
        for (cin, cout, k, s, l_in, l_out) in convs:
            fan = cin * k
            conv_p[br].append((uni(next(keys), (cout, cin, k), fan),   # torch (Cout,Cin,k)
                               uni(next(keys), (cout,), fan)))
    lin_p = [[], []]
    for br in range(2):
        for (nin, nout) in lins:
            lin_p[br].append((uni(next(keys), (nout, nin), nin),       # torch (Nout,Nin)
                              uni(next(keys), (nout,), nin)))
    last_w = uni(next(keys), (1, 2 * n_last), 2 * n_last)
    last_b = uni(next(keys), (1,), 2 * n_last)

    slab = np.zeros((n_rows, width), np.float32)

    # conv layer 0 -- paired with the host-side im2col column layout
    (cin, cout, k, s, l_in, l_out) = convs[0]
    w_off, nin, nout, b_off, _ = plan[0]
    for br in range(2):
        wt, bt = conv_p[br][0]
        blk = np.transpose(wt, (2, 1, 0)).reshape(k * cin, cout)      # row = tap*cin+ci
        for t in range(l_out):
            r0 = w_off + t * (2 * k * cin) + br * (k * cin)
            c0 = t * (2 * cout) + br * cout
            slab[r0:r0 + k * cin, c0:c0 + cout] = blk
            slab[b_off, c0:c0 + cout] = bt

    # deeper conv layers -- block-sparse (time x branch) weight, one matmul each
    for cj in range(1, len(convs)):
        (cin, cout, k, s, l_in, l_out) = convs[cj]
        w_off, nin, nout, b_off, _ = plan[cj]
        for br in range(2):
            wt, bt = conv_p[br][cj]
            for t_out in range(l_out):
                c0 = t_out * (2 * cout) + br * cout
                slab[b_off, c0:c0 + cout] = bt
                for tap in range(k):
                    r0 = w_off + (t_out * s + tap) * (2 * cin) + br * cin
                    slab[r0:r0 + cin, c0:c0 + cout] = wt[:, :, tap].T

    # linear layers -- block-diagonal over the two branches
    for lj, (nin_l, nout_l) in enumerate(lins):
        w_off, nin, nout, b_off, _ = plan[len(convs) + lj]
        for br in range(2):
            wt, bt = lin_p[br][lj]
            slab[w_off + br * nin_l:w_off + (br + 1) * nin_l,
                 br * nout_l:(br + 1) * nout_l] = wt.T
            slab[b_off, br * nout_l:(br + 1) * nout_l] = bt

    # final layer -- fused activation layout already equals cat((x1, x2), 1)
    w_off, nin, nout, b_off, _ = plan[-1]
    slab[w_off:w_off + 2 * n_last, 0:1] = last_w.T
    slab[b_off, 0] = last_b[0]

    raw = (conv_p, lin_p, last_w, last_b)
    return jnp.asarray(slab), raw


# ----------------------------- numpy reference ----------------------------------
def _reference_forward(x, raw):
    """Direct numpy transcription of CNN_11.forward (eval mode, dropout = id)."""
    conv_p, lin_p, last_w, last_b = raw
    c, convs, f, l_final, lins, n_last = _model_dims()
    xn = np.asarray(x, np.float32)

    def conv1d(inp, w, b, s):
        bsz, _, L = inp.shape
        cout, _, k = w.shape
        l_out = (L - k) // s + 1
        out = np.zeros((bsz, cout, l_out), np.float32)
        for t in range(l_out):
            seg = inp[:, :, t * s:t * s + k]
            out[:, :, t] = np.tensordot(seg, w, axes=([1, 2], [1, 2])) + b
        return out

    outs = []
    for br in range(2):
        h = xn[:, br * c:(br + 1) * c, :]
        for (layer, (wt, bt)) in zip(convs, conv_p[br]):
            h = np.maximum(conv1d(h, wt, bt, layer[3]), 0.0)
        h = h.reshape(-1, f)
        for (wt, bt) in lin_p[br]:
            h = np.maximum(h @ wt.T + bt, 0.0)
        outs.append(h)
    cat = np.concatenate(outs, axis=1)
    return cat @ last_w.T + last_b


if __name__ == "__main__":
    key = jax.random.PRNGKey(0)
    kx, kp = jax.random.split(key)
    batch = 2
    x = jax.random.normal(kx, (batch, N_INPUTS, SEQ_LEN), dtype=jnp.float32)
    slab, raw = init_params(kp)

    fwd = jax.jit(cnn11_forward)
    out = fwd(x, slab)
    jax.block_until_ready(out)
    assert out.shape == (batch, 1) and out.dtype == jnp.float32

    ref = _reference_forward(x, raw)
    np.testing.assert_allclose(np.asarray(out), ref, rtol=2e-2, atol=2e-2)
    print("KERNEL_OK")
</pallas_src>

<mosaic_0001>
module attributes {stable_mosaic.version = 11 : i64} {
  func.func @_cnn11_kernel(%arg0: memref<2x64xf32, #tpu.memory_space<vmem>>, %arg1: memref<296x64xf32, #tpu.memory_space<vmem>>, %arg2: memref<2x1xf32, #tpu.memory_space<vmem>>) attributes {dimension_semantics = [], scalar_prefetch = 0 : i64, scratch_operands = 0 : i64, tpu.core_type = #tpu.core_type<tc>} {
    %c0 = arith.constant 0 : index
    %c0_0 = arith.constant 0 : index
    %0 = vector.load %arg0[%c0, %c0_0] : memref<2x64xf32, #tpu.memory_space<vmem>>, vector<2x64xf32>
    %c0_1 = arith.constant 0 : index
    %c0_2 = arith.constant 0 : index
    %1 = vector.load %arg1[%c0_1, %c0_2] : memref<296x64xf32, #tpu.memory_space<vmem>>, vector<64x64xf32>
    %c64 = arith.constant 64 : index
    %c0_3 = arith.constant 0 : index
    %2 = vector.load %arg1[%c64, %c0_3] : memref<296x64xf32, #tpu.memory_space<vmem>>, vector<1x64xf32>
    %cst = arith.constant dense<0.000000e+00> : vector<2x64xf32>
    %3 = tpu.matmul %0, %1, %cst {dimension_numbers = #tpu.dot_dimension_numbers<[1], [0], [0], [1], [0, 0, 1, 1], [], []>} : vector<2x64xf32>, vector<64x64xf32>, vector<2x64xf32> -> vector<2x64xf32>
    %4 = vector.broadcast %2 : vector<1x64xf32> to vector<2x64xf32>
    %5 = arith.addf %3, %4 : vector<2x64xf32>
    %cst_4 = arith.constant 0.000000e+00 : f32
    %6 = vector.broadcast %cst_4 : f32 to vector<2x64xf32>
    %7 = arith.maximumf %5, %6 : vector<2x64xf32>
    %c72 = arith.constant 72 : index
    %c0_5 = arith.constant 0 : index
    %8 = vector.load %arg1[%c72, %c0_5] : memref<296x64xf32, #tpu.memory_space<vmem>>, vector<64x32xf32>
    %c136 = arith.constant 136 : index
    %c0_6 = arith.constant 0 : index
    %9 = vector.load %arg1[%c136, %c0_6] : memref<296x64xf32, #tpu.memory_space<vmem>>, vector<1x32xf32>
    %cst_7 = arith.constant dense<0.000000e+00> : vector<2x32xf32>
    %10 = tpu.matmul %7, %8, %cst_7 {dimension_numbers = #tpu.dot_dimension_numbers<[1], [0], [0], [1], [0, 0, 1, 1], [], []>} : vector<2x64xf32>, vector<64x32xf32>, vector<2x32xf32> -> vector<2x32xf32>
    %11 = vector.broadcast %9 : vector<1x32xf32> to vector<2x32xf32>
    %12 = arith.addf %10, %11 : vector<2x32xf32>
    %cst_8 = arith.constant 0.000000e+00 : f32
    %13 = vector.broadcast %cst_8 : f32 to vector<2x32xf32>
    %14 = arith.maximumf %12, %13 : vector<2x32xf32>
    %c144 = arith.constant 144 : index
    %c0_9 = arith.constant 0 : index
    %15 = vector.load %arg1[%c144, %c0_9] : memref<296x64xf32, #tpu.memory_space<vmem>>, vector<32x64xf32>
    %c176 = arith.constant 176 : index
    %c0_10 = arith.constant 0 : index
    %16 = vector.load %arg1[%c176, %c0_10] : memref<296x64xf32, #tpu.memory_space<vmem>>, vector<1x64xf32>
    %cst_11 = arith.constant dense<0.000000e+00> : vector<2x64xf32>
    %17 = tpu.matmul %14, %15, %cst_11 {dimension_numbers = #tpu.dot_dimension_numbers<[1], [0], [0], [1], [0, 0, 1, 1], [], []>} : vector<2x32xf32>, vector<32x64xf32>, vector<2x64xf32> -> vector<2x64xf32>
    %18 = vector.broadcast %16 : vector<1x64xf32> to vector<2x64xf32>
    %19 = arith.addf %17, %18 : vector<2x64xf32>
    %cst_12 = arith.constant 0.000000e+00 : f32
    %20 = vector.broadcast %cst_12 : f32 to vector<2x64xf32>
    %21 = arith.maximumf %19, %20 : vector<2x64xf32>
    %c184 = arith.constant 184 : index
    %c0_13 = arith.constant 0 : index
    %22 = vector.load %arg1[%c184, %c0_13] : memref<296x64xf32, #tpu.memory_space<vmem>>, vector<64x32xf32>
    %c248 = arith.constant 248 : index
    %c0_14 = arith.constant 0 : index
    %23 = vector.load %arg1[%c248, %c0_14] : memref<296x64xf32, #tpu.memory_space<vmem>>, vector<1x32xf32>
    %cst_15 = arith.constant dense<0.000000e+00> : vector<2x32xf32>
    %24 = tpu.matmul %21, %22, %cst_15 {dimension_numbers = #tpu.dot_dimension_numbers<[1], [0], [0], [1], [0, 0, 1, 1], [], []>} : vector<2x64xf32>, vector<64x32xf32>, vector<2x32xf32> -> vector<2x32xf32>
    %25 = vector.broadcast %23 : vector<1x32xf32> to vector<2x32xf32>
    %26 = arith.addf %24, %25 : vector<2x32xf32>
    %cst_16 = arith.constant 0.000000e+00 : f32
    %27 = vector.broadcast %cst_16 : f32 to vector<2x32xf32>
    %28 = arith.maximumf %26, %27 : vector<2x32xf32>
    %c256 = arith.constant 256 : index
    %c0_17 = arith.constant 0 : index
    %29 = vector.load %arg1[%c256, %c0_17] : memref<296x64xf32, #tpu.memory_space<vmem>>, vector<32x1xf32>
    %c288 = arith.constant 288 : index
    %c0_18 = arith.constant 0 : index
    %30 = vector.load %arg1[%c288, %c0_18] : memref<296x64xf32, #tpu.memory_space<vmem>>, vector<1x1xf32>
    %cst_19 = arith.constant dense<0.000000e+00> : vector<2x1xf32>
    %31 = tpu.matmul %28, %29, %cst_19 {dimension_numbers = #tpu.dot_dimension_numbers<[1], [0], [0], [1], [0, 0, 1, 1], [], []>} : vector<2x32xf32>, vector<32x1xf32>, vector<2x1xf32> -> vector<2x1xf32>
    %32 = vector.broadcast %30 : vector<1x1xf32> to vector<2x1xf32>
    %33 = arith.addf %31, %32 : vector<2x1xf32>
    %c0_20 = arith.constant 0 : index
    %c0_21 = arith.constant 0 : index
    %34 = vector.load %arg2[%c0_20, %c0_21] : memref<2x1xf32, #tpu.memory_space<vmem>>, vector<2x1xf32>
    tpu.vector_store %arg2[%c0_20, %c0_21], %33 {strides = array<i32>} : memref<2x1xf32, #tpu.memory_space<vmem>>, vector<2x1xf32>,
    return
  }
}

</mosaic_0001>

<bundles_post_ra>
// kernel: cnn11_forward.1
= control target key start
LH: loop header
LB: loop body
LE: loop exit
PB: predicated region body
PF: predicated region fallthrough
CT: control target
= control target key end

     0   :  { %v623_v0 = vmov 0.0|0.0   ;;  %vm624_vm0 = vmmov 0   ;;  %v625_v4 = vmov 0.0   ;;  %vm25_vm1 = vcmask 523264   ;;  %s789_s1 = inlined_call_operand.vmem [shape: f32[296,64], index: 1, kind: input, shape index: {}]   ;;  %s790_s0 = inlined_call_operand.vmem [shape: f32[2,64], index: 0, kind: input, shape index: {}]   ;;  %s791_s2 = inlined_call_operand.vmem [shape: f32[2,1], index: 2, kind: output, shape index: {}]  }
   0x1   :  { %572 = vmatprep.subr.bf16.mxu0 %v623_v0  ;;  %v12_v1 = vld [vmem:[%s789_s1] sm:$0xff]  ;;  %v13_v2 = vld [vmem:[%s789_s1 + $0x8] sm:$0xff]  ;;  %v14_v3 = vld [vmem:[%s789_s1 + $0x10] sm:$0xff]  ;;  %509 = vmatprep.mubr.msk.f32.mxu0 %vm624_vm0, %v625_v4  ;;  %vm196_vm2 = vcmask 261120   ;;  %vm440_vm3 = vcmask 1024  }
   0x2   :  { %v573_v5 = vpack.c.bf16 %v13_v2, %v12_v1  ;;  %v15_v6 = vld [vmem:[%s789_s1 + $0x18] sm:$0xff]  ;;  %584 = vmatprep.subr.bf16.mxu1 %v623_v0  ;;  %528 = vmatprep.mubr.msk.f32.mxu1 %vm624_vm0, %v625_v4  ;;  %v100_v8 = vld [vmem:[%s789_s1 + $0x48] sm:$0xff]  ;;  %v101_v9 = vld [vmem:[%s789_s1 + $0x50] sm:$0xff] }
   0x3   :  { %v576_v7 = vpack.c.bf16 %v15_v6, %v14_v3  ;;  %v102_v10 = vld [vmem:[%s789_s1 + $0x58] sm:$0xff]  ;;  %v16_v11 = vld [vmem:[%s789_s1 + $0x20] sm:$0xff]  ;;  %v17_v12 = vld [vmem:[%s789_s1 + $0x28] sm:$0xff]  ;;  %v585_v13 = vpack.c.bf16 %v101_v9, %v100_v8 }
   0x4   :  { %574 = vmatpush3.bf16.msra.mxu0 %v573_v5  ;;  %v103_v14 = vld [vmem:[%s789_s1 + $0x60] sm:$0xff]  ;;  %v579_v16 = vpack.c.bf16 %v17_v12, %v16_v11  ;;  %v104_v17 = vld [vmem:[%s789_s1 + $0x68] sm:$0xff]  ;;  %v105_v18 = vld [vmem:[%s789_s1 + $0x70] sm:$0xff] }
   0x5   :  { %575 = vmatprep.subr.bf16.mxu0 %v623_v0  ;;  %586 = vmatpush3.bf16.msra.mxu1 %v585_v13  ;;  %v588_v15 = vpack.c.bf16 %v103_v14, %v102_v10  ;;  %v18_v19 = vld [vmem:[%s789_s1 + $0x30] sm:$0xff]  ;;  %v19_v20 = vld [vmem:[%s789_s1 + $0x38] sm:$0xff]  ;;  %v591_v21 = vpack.c.bf16 %v105_v18, %v104_v17  ;;  %v11_v23 = vld [vmem:[%s790_s0] sm:$0x3] }
   0x6   :  { %587 = vmatprep.subr.bf16.mxu1 %v623_v0  ;;  %v582_v22 = vpack.c.bf16 %v19_v20, %v18_v19  ;;  %v106_v24 = vld [vmem:[%s789_s1 + $0x78] sm:$0xff]  ;;  %v107_v25 = vld [vmem:[%s789_s1 + $0x80] sm:$0xff]  ;;  %v187_v27 = vld [vmem:[%s789_s1 + $0x90] sm:$0xff] }
   0x7   :  { %v594_v26 = vpack.c.bf16 %v107_v25, %v106_v24  ;;  %v188_v28 = vld [vmem:[%s789_s1 + $0x98] sm:$0xff]  ;;  %v446_v30 = vld [vmem:[%s789_s1 + $0x40] ss:$0 sm:$0xff]  ;;  %v190_v36 = vld [vmem:[%s789_s1 + $0xa8] sm:$0xff] }
   0x8   :  { %577 = vmatpush3.bf16.msra.mxu0 %v576_v7  ;;  %v597_v29 = vpack.c.bf16 %v188_v28, %v187_v27  ;;  %v189_v35 = vld [vmem:[%s789_s1 + $0xa0] sm:$0xff]  ;;  %v271_v38 = vld [vmem:[%s789_s1 + $0xb8] sm:$0xff]  ;;  %v273_v40 = vld [vmem:[%s789_s1 + $0xc8] sm:$0xff] }
   0x9   :  { %578 = vmatprep.subr.bf16.mxu0 %v623_v0  ;;  %589 = vmatpush3.bf16.msra.mxu1 %v588_v15  ;;  %v600_v37 = vpack.c.bf16 %v190_v36, %v189_v35  ;;  %v272_v39 = vld [vmem:[%s789_s1 + $0xc0] sm:$0xff]  ;;  %v274_v42 = vld [vmem:[%s789_s1 + $0xd0] sm:$0xff]  ;;  %v275_v44 = vld [vmem:[%s789_s1 + $0xd8] sm:$0xff] }
   0xa   :  { %590 = vmatprep.subr.bf16.mxu1 %v623_v0  ;;  %v603_v41 = vpack.c.bf16 %v272_v39, %v271_v38  ;;  %v606_v43 = vpack.c.bf16 %v274_v42, %v273_v40  ;;  %v276_v45 = vld [vmem:[%s789_s1 + $0xe0] sm:$0xff]  ;;  %v448_v47 = vld [vmem:[%s789_s1 + $0x88] ss:$0 sm:$0xff]  ;;  %v278_v53 = vld [vmem:[%s789_s1 + $0xf0] sm:$0xff] }
   0xb   :  { %v609_v46 = vpack.c.bf16 %v276_v45, %v275_v44  ;;  %v277_v52 = vld [vmem:[%s789_s1 + $0xe8] sm:$0xff]  ;;  %v358_v55 = vld [vmem:[%s789_s1 + $0x100] sm:$0xff]  ;;  %v450_v58 = vld [vmem:[%s789_s1 + $0xb0] ss:$0 sm:$0xff] }
   0xc   :  { %580 = vmatpush3.bf16.msra.mxu0 %v579_v16  ;;  %v612_v54 = vpack.c.bf16 %v278_v53, %v277_v52  ;;  %v359_v56 = vld [vmem:[%s789_s1 + $0x108] sm:$0xff]  ;;  %v360_v63 = vld [vmem:[%s789_s1 + $0x110] sm:$0xff]  ;;  %v361_v1 = vld [vmem:[%s789_s1 + $0x118] sm:$0xff] }
   0xd   :  { %581 = vmatprep.subr.bf16.mxu0 %v623_v0  ;;  %592 = vmatpush3.bf16.msra.mxu1 %v591_v21  ;;  %v615_v57 = vpack.c.bf16 %v359_v56, %v358_v55  ;;  %v618_v2 = vpack.c.bf16 %v361_v1, %v360_v63  ;;  %v454_v7 = vld [vmem:[%s789_s1 + $0x120] ss:$0 sm:$0xff] }
   0xe   :  { %593 = vmatprep.subr.bf16.mxu1 %v623_v0 }
  0x10   :  { %583 = vmatpush3.bf16.msra.mxu0 %v582_v22 }
  0x11   :  { %596 = vmatprep.subr.bf16.mxu0 %v623_v0  ;;  %595 = vmatpush3.bf16.msra.mxu1 %v594_v26 }
  0x12   :  { %602 = vmatprep.subr.bf16.mxu1 %v623_v0 }
  0x13   :  { %510 = vmatmul.mubr.msk.f32.vlgmr.msra.gmra.mrb[0].mxu0 %vm25_vm1, %v11_v23 }
  0x14   :  { %539 = vmatprep.mubr.msk.f32.mxu0 %vm624_vm0, %v625_v4  ;;  %598 = vmatpush3.bf16.msra.mxu0 %v597_v29 }
  0x15   :  { %599 = vmatprep.subr.bf16.mxu0 %v623_v0 }
  0x18   :  { %601 = vmatpush3.bf16.msra.mxu0 %v600_v37 }
  0x19   :  { %614 = vmatprep.subr.bf16.mxu0 %v623_v0 }
  0xe6   :  { %v95_v31 = vpop.f32.mrb[0].mxu0 }
  0xe7   :  { %v96_v32 = vadd.f32 %v446_v30, %v95_v31  ;;  %v511_v33 = vpop.f32.mrb[1].mxu0 }
  0xe9   :  { %v99_v34 = vmax.f32 %v96_v32, 0.0 }
  0xeb   :  { %529 = vmatmul.mubr.msk.f32.vlgmr.msra.gmra.mrb[0].mxu1 %vm25_vm1, %v99_v34 }
  0xec   :  { %558 = vmatprep.mubr.msk.f32.mxu1 %vm624_vm0, %v625_v4  ;;  %604 = vmatpush3.bf16.msra.mxu1 %v603_v41 }
  0xed   :  { %605 = vmatprep.subr.bf16.mxu1 %v623_v0 }
  0xf0   :  { %607 = vmatpush3.bf16.msra.mxu1 %v606_v43 }
  0xf1   :  { %608 = vmatprep.subr.bf16.mxu1 %v623_v0 }
  0xf4   :  { %610 = vmatpush3.bf16.msra.mxu1 %v609_v46 }
  0xf5   :  { %611 = vmatprep.subr.bf16.mxu1 %v623_v0 }
  0xf8   :  { %613 = vmatpush3.bf16.msra.mxu1 %v612_v54 }
 0x1be   :  { %v182_v48 = vpop.f32.mrb[0].mxu1 }
 0x1bf   :  { %v183_v49 = vadd.f32 %v448_v47, %v182_v48  ;;  %v530_v50 = vpop.f32.mrb[1].mxu1 }
 0x1c1   :  { %v186_v51 = vmax.f32 %v183_v49, 0.0 }
 0x1c3   :  { %540 = vmatmul.mubr.msk.f32.vlgmr.msra.gmra.mrb[2].mxu0 %vm196_vm2, %v186_v51 }
 0x1c4   :  { %569 = vmatprep.mubr.msk.f32.mxu0 %vm624_vm0, %v625_v4  ;;  %616 = vmatpush3.bf16.msra.mxu0 %v615_v57 }
 0x1c5   :  { %617 = vmatprep.subr.bf16.mxu0 %v623_v0  ;;  %v452_v0 = vld [vmem:[%s789_s1 + $0xf8] ss:$0 sm:$0xff] }
 0x1c8   :  { %619 = vmatpush3.bf16.msra.mxu0 %v618_v2 }
 0x296   :  { %v266_v59 = vpop.f32.mrb[2].mxu0 }
 0x297   :  { %v267_v60 = vadd.f32 %v450_v58, %v266_v59  ;;  %v541_v61 = vpop.f32.mrb[3].mxu0 }
 0x299   :  { %v270_v62 = vmax.f32 %v267_v60, 0.0 }
 0x29b   :  { %559 = vmatmul.mubr.msk.f32.vlgmr.msra.gmra.mrb[2].mxu1 %vm25_vm1, %v270_v62 }
 0x36e   :  { %v353_v3 = vpop.f32.mrb[2].mxu1 }
 0x36f   :  { %v354_v4 = vadd.f32 %v452_v0, %v353_v3  ;;  %v560_v5 = vpop.f32.mrb[3].mxu1 }
 0x371   :  { %v357_v6 = vmax.f32 %v354_v4, 0.0 }
 0x373   :  { %570 = vmatmul.mubr.msk.f32.vlgmr.msra.gmra.mrb[4].mxu0 %vm196_vm2, %v357_v6 }
 0x446   :  { %v436_v8 = vpop.f32.mrb[4].mxu0 }
 0x447   :  { %v437_v9 = vadd.f32 %v454_v7, %v436_v8  ;;  %v571_v10 = vpop.f32.mrb[5].mxu0 }
 0x449   :  { %441 = vst.msk [vmem:[%s791_s2] sm:$0x3] %vm440_vm3, %v437_v9 }

</bundles_post_ra>
